<compile_context>
chip_gen: v7x
topology: tpu7x:2x2x1
jax: 0.10.0
libtpu: 0.0.40
codegen_flags: <defaults>
</compile_context>

<pallas_src>
import jax
import jax.numpy as jnp
from jax.experimental import pallas as pl
from jax.experimental.pallas import tpu as pltpu

UNITS = 32
INPUT = 12
OUTPUT = 3
HIDDEN_LAYERS = 3
NUM_LAYERS = HIDDEN_LAYERS + 2          # 5 Linear layers total

PAD_F = 128                              # lane-padded feature width (in & out)
BIAS_ROWS = 8                            # sublane-aligned rows for bias (row 0 used)
ROWS_PER_LAYER = PAD_F + BIAS_ROWS       # 136
MAX_TILE_B = 128                         # batch tile


def mlp_kernel(x_ref, p_ref, out_ref):
    """Full 5-layer MLP on one (tile_b, 128) activation tile.

    p_ref: (NUM_LAYERS, 136, 128) slab.
      p_ref[l, :128, :]  = weight l, zero-padded to (128, 128)
      p_ref[l, 128, :]   = bias   l, zero-padded to 128 lanes
    Zero padding keeps the math exact (padded lanes/rows contribute 0, tanh(0)=0).
    """
    h = x_ref[...]
    for l in range(NUM_LAYERS):
        w = p_ref[l, :PAD_F, :]                    # (128, 128) static view
        bias = p_ref[l, PAD_F:PAD_F + 1, :]        # (1, 128)
        h = jnp.dot(h, w, preferred_element_type=jnp.float32) + bias
        if l < NUM_LAYERS - 1:                     # no activation on output layer
            h = jnp.tanh(h)
    out_ref[...] = h


def init_params(key):
    """Deterministic xavier-normal-ish init for all Linear layers."""
    dims = [INPUT] + [UNITS] * (HIDDEN_LAYERS + 1) + [OUTPUT]
    params = []
    for fan_in, fan_out in zip(dims[:-1], dims[1:]):
        key, wk = jax.random.split(key)
        std = (2.0 / (fan_in + fan_out)) ** 0.5
        w = std * jax.random.normal(wk, (fan_in, fan_out), dtype=jnp.float32)
        b = jnp.zeros((fan_out,), dtype=jnp.float32)
        params.append((w, b))
    return params


def pack_params(params):
    """Pack all (W, b) into a single lane-padded slab -> one DMA at run time."""
    slab = jnp.zeros((NUM_LAYERS, ROWS_PER_LAYER, PAD_F), dtype=jnp.float32)
    for l, (w, b) in enumerate(params):
        fin, fout = w.shape
        slab = slab.at[l, :fin, :fout].set(w.astype(jnp.float32))
        slab = slab.at[l, PAD_F, :fout].set(b.reshape(-1).astype(jnp.float32))
    return slab


@jax.jit
def neural_network_forward(features, param_slab):
    # nn.Flatten equivalent
    b = features.shape[0]
    x = features.reshape(b, -1).astype(jnp.float32)
    assert x.shape[1] == INPUT

    # Sublane-align the batch tile, lane-pad features to 128.
    tile_b = min(MAX_TILE_B, ((b + 7) // 8) * 8)
    bp = ((b + tile_b - 1) // tile_b) * tile_b
    x_pad = jnp.zeros((bp, PAD_F), jnp.float32).at[:b, :INPUT].set(x)

    out = pl.pallas_call(
        mlp_kernel,
        out_shape=jax.ShapeDtypeStruct((bp, PAD_F), jnp.float32),
        grid_spec=pltpu.PrefetchScalarGridSpec(
            num_scalar_prefetch=0,
            grid=(bp // tile_b,),
            in_specs=[
                # activations: tiled over the batch grid
                pl.BlockSpec((tile_b, PAD_F), lambda i: (i, 0)),
                # packed parameters: constant index_map -> VMEM-resident
                pl.BlockSpec((NUM_LAYERS, ROWS_PER_LAYER, PAD_F),
                             lambda i: (0, 0, 0)),
            ],
            out_specs=pl.BlockSpec((tile_b, PAD_F), lambda i: (i, 0)),
        ),
        compiler_params=pltpu.CompilerParams(
            dimension_semantics=("parallel",)),   # v7x: 2 TCs split the batch
    )(x_pad, param_slab)

    # Drop batch / lane padding.
    return out[:b, :OUTPUT]


def reference_forward(features, params):
    b = features.shape[0]
    h = features.reshape(b, -1).astype(jnp.float32)
    for i, (w, bias) in enumerate(params):
        h = h @ w + bias
        if i < len(params) - 1:
            h = jnp.tanh(h)
    return h


if __name__ == "__main__":
    key = jax.random.PRNGKey(0)
    pkey, xkey = jax.random.split(key)
    params = init_params(pkey)
    param_slab = pack_params(params)

    # batch=8, features (3, 4) -> flattened to 12, matching Linear(input=12)
    x = jax.random.normal(xkey, (8, 3, 4), dtype=jnp.float32)

    out = neural_network_forward(x, param_slab)
    out = jax.block_until_ready(out)

    ref = reference_forward(x, params)
    assert out.shape == (8, OUTPUT)
    assert jnp.allclose(out, ref, atol=1e-5, rtol=1e-5), (
        f"max abs err = {jnp.max(jnp.abs(out - ref))}")

    print("KERNEL_OK")
</pallas_src>

<mosaic_0001>
module attributes {stable_mosaic.version = 11 : i64} {
  func.func @mlp_kernel(%arg0: i32, %arg1: memref<8x128xf32, #tpu.memory_space<vmem>>, %arg2: memref<5x136x128xf32, #tpu.memory_space<vmem>>, %arg3: memref<8x128xf32, #tpu.memory_space<vmem>>) attributes {dimension_semantics = [#tpu.dimension_semantics<parallel>], iteration_bounds = array<i64: 1>, scalar_prefetch = 0 : i64, scratch_operands = 0 : i64, tpu.core_type = #tpu.core_type<tc>, window_params = [{transform_indices = @transform_0, window_bounds = array<i64: 8, 128>}, {pipeline_mode = #tpu.pipeline_mode<synchronous>, transform_indices = @transform_1, window_bounds = array<i64: 5, 136, 128>}, {transform_indices = @transform_2, window_bounds = array<i64: 8, 128>}]} {
    %c0 = arith.constant 0 : index
    %c0_0 = arith.constant 0 : index
    %0 = vector.load %arg1[%c0, %c0_0] : memref<8x128xf32, #tpu.memory_space<vmem>>, vector<8x128xf32>
    %c0_1 = arith.constant 0 : index
    %c0_2 = arith.constant 0 : index
    %c0_3 = arith.constant 0 : index
    %1 = vector.load %arg2[%c0_1, %c0_2, %c0_3] : memref<5x136x128xf32, #tpu.memory_space<vmem>>, vector<1x128x128xf32>
    %2 = vector.shape_cast %1 : vector<1x128x128xf32> to vector<128x128xf32>
    %c0_4 = arith.constant 0 : index
    %c128 = arith.constant 128 : index
    %c0_5 = arith.constant 0 : index
    %3 = vector.load %arg2[%c0_4, %c128, %c0_5] : memref<5x136x128xf32, #tpu.memory_space<vmem>>, vector<1x1x128xf32>
    %4 = vector.shape_cast %3 : vector<1x1x128xf32> to vector<1x128xf32>
    %cst = arith.constant dense<0.000000e+00> : vector<8x128xf32>
    %5 = tpu.matmul %0, %2, %cst {dimension_numbers = #tpu.dot_dimension_numbers<[1], [0], [0], [1], [0, 0, 1, 1], [], []>} : vector<8x128xf32>, vector<128x128xf32>, vector<8x128xf32> -> vector<8x128xf32>
    %6 = vector.broadcast %4 : vector<1x128xf32> to vector<8x128xf32>
    %7 = arith.addf %5, %6 : vector<8x128xf32>
    %8 = math.tanh %7 : vector<8x128xf32>
    %c1 = arith.constant 1 : index
    %c0_6 = arith.constant 0 : index
    %c0_7 = arith.constant 0 : index
    %9 = vector.load %arg2[%c1, %c0_6, %c0_7] : memref<5x136x128xf32, #tpu.memory_space<vmem>>, vector<1x128x128xf32>
    %10 = vector.shape_cast %9 : vector<1x128x128xf32> to vector<128x128xf32>
    %c1_8 = arith.constant 1 : index
    %c128_9 = arith.constant 128 : index
    %c0_10 = arith.constant 0 : index
    %11 = vector.load %arg2[%c1_8, %c128_9, %c0_10] : memref<5x136x128xf32, #tpu.memory_space<vmem>>, vector<1x1x128xf32>
    %12 = vector.shape_cast %11 : vector<1x1x128xf32> to vector<1x128xf32>
    %cst_11 = arith.constant dense<0.000000e+00> : vector<8x128xf32>
    %13 = tpu.matmul %8, %10, %cst_11 {dimension_numbers = #tpu.dot_dimension_numbers<[1], [0], [0], [1], [0, 0, 1, 1], [], []>} : vector<8x128xf32>, vector<128x128xf32>, vector<8x128xf32> -> vector<8x128xf32>
    %14 = vector.broadcast %12 : vector<1x128xf32> to vector<8x128xf32>
    %15 = arith.addf %13, %14 : vector<8x128xf32>
    %16 = math.tanh %15 : vector<8x128xf32>
    %c2 = arith.constant 2 : index
    %c0_12 = arith.constant 0 : index
    %c0_13 = arith.constant 0 : index
    %17 = vector.load %arg2[%c2, %c0_12, %c0_13] : memref<5x136x128xf32, #tpu.memory_space<vmem>>, vector<1x128x128xf32>
    %18 = vector.shape_cast %17 : vector<1x128x128xf32> to vector<128x128xf32>
    %c2_14 = arith.constant 2 : index
    %c128_15 = arith.constant 128 : index
    %c0_16 = arith.constant 0 : index
    %19 = vector.load %arg2[%c2_14, %c128_15, %c0_16] : memref<5x136x128xf32, #tpu.memory_space<vmem>>, vector<1x1x128xf32>
    %20 = vector.shape_cast %19 : vector<1x1x128xf32> to vector<1x128xf32>
    %cst_17 = arith.constant dense<0.000000e+00> : vector<8x128xf32>
    %21 = tpu.matmul %16, %18, %cst_17 {dimension_numbers = #tpu.dot_dimension_numbers<[1], [0], [0], [1], [0, 0, 1, 1], [], []>} : vector<8x128xf32>, vector<128x128xf32>, vector<8x128xf32> -> vector<8x128xf32>
    %22 = vector.broadcast %20 : vector<1x128xf32> to vector<8x128xf32>
    %23 = arith.addf %21, %22 : vector<8x128xf32>
    %24 = math.tanh %23 : vector<8x128xf32>
    %c3 = arith.constant 3 : index
    %c0_18 = arith.constant 0 : index
    %c0_19 = arith.constant 0 : index
    %25 = vector.load %arg2[%c3, %c0_18, %c0_19] : memref<5x136x128xf32, #tpu.memory_space<vmem>>, vector<1x128x128xf32>
    %26 = vector.shape_cast %25 : vector<1x128x128xf32> to vector<128x128xf32>
    %c3_20 = arith.constant 3 : index
    %c128_21 = arith.constant 128 : index
    %c0_22 = arith.constant 0 : index
    %27 = vector.load %arg2[%c3_20, %c128_21, %c0_22] : memref<5x136x128xf32, #tpu.memory_space<vmem>>, vector<1x1x128xf32>
    %28 = vector.shape_cast %27 : vector<1x1x128xf32> to vector<1x128xf32>
    %cst_23 = arith.constant dense<0.000000e+00> : vector<8x128xf32>
    %29 = tpu.matmul %24, %26, %cst_23 {dimension_numbers = #tpu.dot_dimension_numbers<[1], [0], [0], [1], [0, 0, 1, 1], [], []>} : vector<8x128xf32>, vector<128x128xf32>, vector<8x128xf32> -> vector<8x128xf32>
    %30 = vector.broadcast %28 : vector<1x128xf32> to vector<8x128xf32>
    %31 = arith.addf %29, %30 : vector<8x128xf32>
    %32 = math.tanh %31 : vector<8x128xf32>
    %c4 = arith.constant 4 : index
    %c0_24 = arith.constant 0 : index
    %c0_25 = arith.constant 0 : index
    %33 = vector.load %arg2[%c4, %c0_24, %c0_25] : memref<5x136x128xf32, #tpu.memory_space<vmem>>, vector<1x128x128xf32>
    %34 = vector.shape_cast %33 : vector<1x128x128xf32> to vector<128x128xf32>
    %c4_26 = arith.constant 4 : index
    %c128_27 = arith.constant 128 : index
    %c0_28 = arith.constant 0 : index
    %35 = vector.load %arg2[%c4_26, %c128_27, %c0_28] : memref<5x136x128xf32, #tpu.memory_space<vmem>>, vector<1x1x128xf32>
    %36 = vector.shape_cast %35 : vector<1x1x128xf32> to vector<1x128xf32>
    %cst_29 = arith.constant dense<0.000000e+00> : vector<8x128xf32>
    %37 = tpu.matmul %32, %34, %cst_29 {dimension_numbers = #tpu.dot_dimension_numbers<[1], [0], [0], [1], [0, 0, 1, 1], [], []>} : vector<8x128xf32>, vector<128x128xf32>, vector<8x128xf32> -> vector<8x128xf32>
    %38 = vector.broadcast %36 : vector<1x128xf32> to vector<8x128xf32>
    %39 = arith.addf %37, %38 : vector<8x128xf32>
    %c0_30 = arith.constant 0 : index
    %c0_31 = arith.constant 0 : index
    %40 = vector.load %arg3[%c0_30, %c0_31] : memref<8x128xf32, #tpu.memory_space<vmem>>, vector<8x128xf32>
    tpu.vector_store %arg3[%c0_30, %c0_31], %39 {strides = array<i32>} : memref<8x128xf32, #tpu.memory_space<vmem>>, vector<8x128xf32>,
    return
  }
  func.func @transform_0(%arg0: i32) -> (i32, i32) {
    %c0_i32 = arith.constant 0 : i32
    %c0_i32_0 = arith.constant 0 : i32
    return %arg0, %c0_i32 : i32, i32
  }
  func.func @transform_1(%arg0: i32) -> (i32, i32, i32) {
    %c0_i32 = arith.constant 0 : i32
    %c0_i32_0 = arith.constant 0 : i32
    %c0_i32_1 = arith.constant 0 : i32
    %c0_i32_2 = arith.constant 0 : i32
    return %c0_i32, %c0_i32_0, %c0_i32_1 : i32, i32, i32
  }
  func.func @transform_2(%arg0: i32) -> (i32, i32) {
    %c0_i32 = arith.constant 0 : i32
    %c0_i32_0 = arith.constant 0 : i32
    return %arg0, %c0_i32 : i32, i32
  }
}

</mosaic_0001>

<bundles_post_ra>
// kernel: neural_network_forward.1
= control target key start
LH: loop header
LB: loop body
LE: loop exit
PB: predicated region body
PF: predicated region fallthrough
CT: control target
= control target key end

     0   :  { %7 = vsyncpa [#allocation3], 0  ;;  %s918_s9 = smov [#allocation2]   ;;  %s1007_s0 = inlined_call_operand.vmem [shape: f32[8,128], index: 0, kind: input, shape index: {}]   ;;  %s1008_s1 = inlined_call_operand.hbm [shape: f32[5,136,128], index: 1, kind: input, shape index: {}]   ;;  %s1009_s2 = inlined_call_operand.vmem [shape: f32[8,128], index: 2, kind: output, shape index: {}]  }
   0x1   :  { %s15_s10 = sshll.u32 %s918_s9, 4  ;;  %s894_s13 = scalar_lea.hbm %s1008_s1, 10880  ;;  %s16_s10 = int_to_ptr.vmem [resolvable:$true] %s15_s10 }
   0x2   :  { %p895_p0 = scmp.ne.s32.totalorder %s1008_s1, %s894_s13  ;;  %p898_p1 = scmp.lt.u32.totalorder %s894_s13, %s1008_s1 }
   0x4   :  { %p900_p2 = pnand %p898_p1, %p895_p0 }
   0x6   :  { %903 = shalt.err (!%p900_p2)
}
   0x7   :  { %s904_s18 = scalar_lea.vmem %s16_s10, 10880  ;;  %p909_p4 = scmp.lt.s32.totalorder %s16_s10, %s16_s10 }
   0x8   :  { %p905_p3 = scmp.ne.s32.totalorder %s16_s10, %s904_s18  ;;  %p910_p5 = scmp.lt.s32.totalorder %s904_s18, %s904_s18 }
   0xa   :  { %p911_p6 = por %p910_p5, %p909_p4 }
   0xc   :  { %p912_p7 = pnand %p911_p6, %p905_p3 }
   0xe   :  { %915 = shalt.err (!%p912_p7)
}
   0xf   :  { %s919_s19 = smov 128   ;;  %s920_s20 = smov 8  }
  0x10   :  { %21 = dma.hbm_to_vmem [thread:$0]  %s1008_s1, 10880, %s16_s10, [#allocation3], %s919_s19, %s919_s19, %s920_s20  }
  0x11   :  { %916 = dma.done.wait [#allocation3], 10880  }
  0x12   :  { %917 = vsyncadd [#allocation3], 4294956416  ;;  %v921_v0 = vmov 0.0|0.0   ;;  %vm922_vm0 = vmmov 0   ;;  %v923_v1 = vmov 0.0   ;;  %v26_v2 = vld [vmem:[#allocation2] sm:$0xff] }
  0x13   :  { %760 = vmatprep.subr.bf16.mxu0 %v921_v0  ;;  %617 = vmatprep.mubr.msk.f32.mxu0 %vm922_vm0, %v923_v1  ;;  %v27_v3 = vld [vmem:[#allocation2 + $0x8] sm:$0xff]  ;;  %v28_v4 = vld [vmem:[#allocation2 + $0x10] sm:$0xff]  ;;  %v29_v6 = vld [vmem:[#allocation2 + $0x18] sm:$0xff] }
  0x14   :  { %784 = vmatprep.subr.bf16.mxu1 %v921_v0  ;;  %652 = vmatprep.mubr.msk.f32.mxu1 %vm922_vm0, %v923_v1  ;;  %v761_v5 = vpack.c.bf16 %v27_v3, %v26_v2  ;;  %v764_v7 = vpack.c.bf16 %v29_v6, %v28_v4  ;;  %v30_v8 = vld [vmem:[#allocation2 + $0x20] sm:$0xff]  ;;  %v31_v9 = vld [vmem:[#allocation2 + $0x28] sm:$0xff]  ;;  %v120_v11 = vld [vmem:[#allocation2 + $0x90] sm:$0xff] }
  0x15   :  { %v119_v10 = vld [vmem:[#allocation2 + $0x88] sm:$0xff]  ;;  %v121_v12 = vld [vmem:[#allocation2 + $0x98] sm:$0xff]  ;;  %v122_v13 = vld [vmem:[#allocation2 + $0xa0] sm:$0xff]  ;;  %v767_v14 = vpack.c.bf16 %v31_v9, %v30_v8 }
  0x16   :  { %762 = vmatpush3.bf16.msra.mxu0 %v761_v5  ;;  %v785_v15 = vpack.c.bf16 %v120_v11, %v119_v10  ;;  %v32_v16 = vld [vmem:[#allocation2 + $0x30] sm:$0xff]  ;;  %v33_v17 = vld [vmem:[#allocation2 + $0x38] sm:$0xff]  ;;  %v788_v18 = vpack.c.bf16 %v122_v13, %v121_v12  ;;  %v123_v19 = vld [vmem:[#allocation2 + $0xa8] sm:$0xff] }
  0x17   :  { %763 = vmatprep.subr.bf16.mxu0 %v921_v0  ;;  %v124_v20 = vld [vmem:[#allocation2 + $0xb0] sm:$0xff]  ;;  %v770_v21 = vpack.c.bf16 %v33_v17, %v32_v16  ;;  %v34_v22 = vld [vmem:[#allocation2 + $0x40] sm:$0xff]  ;;  %v35_v23 = vld [vmem:[#allocation2 + $0x48] sm:$0xff] }
  0x18   :  { %786 = vmatpush3.bf16.msra.mxu1 %v785_v15  ;;  %v791_v24 = vpack.c.bf16 %v124_v20, %v123_v19  ;;  %v125_v25 = vld [vmem:[#allocation2 + $0xb8] sm:$0xff]  ;;  %v126_v26 = vld [vmem:[#allocation2 + $0xc0] sm:$0xff]  ;;  %v773_v27 = vpack.c.bf16 %v35_v23, %v34_v22  ;;  %v36_v28 = vld [vmem:[#allocation2 + $0x50] sm:$0xff] }
  0x19   :  { %787 = vmatprep.subr.bf16.mxu1 %v921_v0  ;;  %v37_v29 = vld [vmem:[#allocation2 + $0x58] sm:$0xff]  ;;  %v794_v30 = vpack.c.bf16 %v126_v26, %v125_v25  ;;  %v127_v31 = vld [vmem:[#allocation2 + $0xc8] sm:$0xff]  ;;  %v128_v32 = vld [vmem:[#allocation2 + $0xd0] sm:$0xff] }
  0x1a   :  { %765 = vmatpush3.bf16.msra.mxu0 %v764_v7  ;;  %v776_v33 = vpack.c.bf16 %v37_v29, %v36_v28  ;;  %v38_v34 = vld [vmem:[#allocation2 + $0x60] sm:$0xff]  ;;  %v39_v35 = vld [vmem:[#allocation2 + $0x68] sm:$0xff]  ;;  %v797_v36 = vpack.c.bf16 %v128_v32, %v127_v31  ;;  %v40_v38 = vld [vmem:[#allocation2 + $0x70] sm:$0xff] }
  0x1b   :  { %766 = vmatprep.subr.bf16.mxu0 %v921_v0  ;;  %v779_v37 = vpack.c.bf16 %v39_v35, %v38_v34  ;;  %v41_v39 = vld [vmem:[#allocation2 + $0x78] sm:$0xff]  ;;  %v25_v41 = vld [vmem:[%s1007_s0] sm:$0xff]  ;;  %v131_v45 = vld [vmem:[#allocation2 + $0xe8] sm:$0xff] }
  0x1c   :  { %789 = vmatpush3.bf16.msra.mxu1 %v788_v18  ;;  %v782_v40 = vpack.c.bf16 %v41_v39, %v40_v38  ;;  %v129_v42 = vld [vmem:[#allocation2 + $0xd8] sm:$0xff]  ;;  %v130_v43 = vld [vmem:[#allocation2 + $0xe0] sm:$0xff]  ;;  %v132_v46 = vld [vmem:[#allocation2 + $0xf0] sm:$0xff] }
  0x1d   :  { %790 = vmatprep.subr.bf16.mxu1 %v921_v0  ;;  %v800_v44 = vpack.c.bf16 %v130_v43, %v129_v42  ;;  %v803_v47 = vpack.c.bf16 %v132_v46, %v131_v45  ;;  %v133_v48 = vld [vmem:[#allocation2 + $0xf8] sm:$0xff]  ;;  %v134_v49 = vld [vmem:[#allocation2 + $0x100] sm:$0xff]  ;;  %v212_v51 = vld [vmem:[#allocation2 + $0x110] sm:$0xff] }
  0x1e   :  { %768 = vmatpush3.bf16.msra.mxu0 %v767_v14  ;;  %v806_v50 = vpack.c.bf16 %v134_v49, %v133_v48  ;;  %v213_v52 = vld [vmem:[#allocation2 + $0x118] sm:$0xff]  ;;  %v214_v53 = vld [vmem:[#allocation2 + $0x120] sm:$0xff]  ;;  %v215_v55 = vld [vmem:[#allocation2 + $0x128] sm:$0xff] }
  0x1f   :  { %769 = vmatprep.subr.bf16.mxu0 %v921_v0  ;;  %v809_v54 = vpack.c.bf16 %v213_v52, %v212_v51  ;;  %v812_v56 = vpack.c.bf16 %v215_v55, %v214_v53  ;;  %v216_v57 = vld [vmem:[#allocation2 + $0x130] sm:$0xff]  ;;  %v217_v58 = vld [vmem:[#allocation2 + $0x138] sm:$0xff]  ;;  %v218_v60 = vld [vmem:[#allocation2 + $0x140] sm:$0xff] }
  0x20   :  { %792 = vmatpush3.bf16.msra.mxu1 %v791_v24  ;;  %v815_v59 = vpack.c.bf16 %v217_v58, %v216_v57  ;;  %v219_v61 = vld [vmem:[#allocation2 + $0x148] sm:$0xff]  ;;  %v220_v63 = vld [vmem:[#allocation2 + $0x150] sm:$0xff]  ;;  %v221_v2 = vld [vmem:[#allocation2 + $0x158] sm:$0xff] }
  0x21   :  { %793 = vmatprep.subr.bf16.mxu1 %v921_v0  ;;  %v818_v62 = vpack.c.bf16 %v219_v61, %v218_v60  ;;  %v821_v3 = vpack.c.bf16 %v221_v2, %v220_v63  ;;  %v495_v4 = vld [vmem:[#allocation2 + $0x80] ss:$0 sm:$0xff]  ;;  %v223_v10 = vld [vmem:[#allocation2 + $0x168] sm:$0xff]  ;;  %v224_v12 = vld [vmem:[#allocation2 + $0x170] sm:$0xff] }
  0x22   :  { %771 = vmatpush3.bf16.msra.mxu0 %v770_v21  ;;  %v222_v9 = vld [vmem:[#allocation2 + $0x160] sm:$0xff]  ;;  %v225_v13 = vld [vmem:[#allocation2 + $0x178] sm:$0xff]  ;;  %v227_v16 = vld [vmem:[#allocation2 + $0x188] sm:$0xff] }
  0x23   :  { %772 = vmatprep.subr.bf16.mxu0 %v921_v0  ;;  %v824_v11 = vpack.c.bf16 %v223_v10, %v222_v9  ;;  %v827_v14 = vpack.c.bf16 %v225_v13, %v224_v12  ;;  %v226_v15 = vld [vmem:[#allocation2 + $0x180] sm:$0xff]  ;;  %v305_v18 = vld [vmem:[#allocation2 + $0x198] sm:$0xff]  ;;  %v307_v20 = vld [vmem:[#allocation2 + $0x1a8] sm:$0xff] }
  0x24   :  { %795 = vmatpush3.bf16.msra.mxu1 %v794_v30  ;;  %v830_v17 = vpack.c.bf16 %v227_v16, %v226_v15  ;;  %v306_v19 = vld [vmem:[#allocation2 + $0x1a0] sm:$0xff]  ;;  %v308_v22 = vld [vmem:[#allocation2 + $0x1b0] sm:$0xff]  ;;  %v309_v24 = vld [vmem:[#allocation2 + $0x1b8] sm:$0xff] }
  0x25   :  { %796 = vmatprep.subr.bf16.mxu1 %v921_v0  ;;  %v833_v21 = vpack.c.bf16 %v306_v19, %v305_v18  ;;  %v836_v23 = vpack.c.bf16 %v308_v22, %v307_v20  ;;  %v310_v25 = vld [vmem:[#allocation2 + $0x1c0] sm:$0xff]  ;;  %v312_v28 = vld [vmem:[#allocation2 + $0x1d0] sm:$0xff]  ;;  %v313_v30 = vld [vmem:[#allocation2 + $0x1d8] sm:$0xff] }
  0x26   :  { %774 = vmatpush3.bf16.msra.mxu0 %v773_v27  ;;  %v839_v26 = vpack.c.bf16 %v310_v25, %v309_v24  ;;  %v311_v27 = vld [vmem:[#allocation2 + $0x1c8] sm:$0xff]  ;;  %v314_v31 = vld [vmem:[#allocation2 + $0x1e0] sm:$0xff]  ;;  %v316_v39 = vld [vmem:[#allocation2 + $0x1f0] sm:$0xff] }
  0x27   :  { %775 = vmatprep.subr.bf16.mxu0 %v921_v0  ;;  %v842_v29 = vpack.c.bf16 %v312_v28, %v311_v27  ;;  %v845_v32 = vpack.c.bf16 %v314_v31, %v313_v30  ;;  %v315_v38 = vld [vmem:[#allocation2 + $0x1e8] sm:$0xff]  ;;  %v318_v42 = vld [vmem:[#allocation2 + $0x200] sm:$0xff]  ;;  %v320_v45 = vld [vmem:[#allocation2 + $0x210] sm:$0xff] }
  0x28   :  { %798 = vmatpush3.bf16.msra.mxu1 %v797_v36  ;;  %v399_v48 = vld [vmem:[#allocation2 + $0x228] sm:$0xff]  ;;  %v400_v49 = vld [vmem:[#allocation2 + $0x230] sm:$0xff]  ;;  %v402_v52 = vld [vmem:[#allocation2 + $0x240] sm:$0xff] }
  0x29   :  { %799 = vmatprep.subr.bf16.mxu1 %v921_v0  ;;  %v403_v53 = vld [vmem:[#allocation2 + $0x248] sm:$0xff]  ;;  %v404_v55 = vld [vmem:[#allocation2 + $0x250] sm:$0xff]  ;;  %v406_v58 = vld [vmem:[#allocation2 + $0x260] sm:$0xff] }
  0x2a   :  { %777 = vmatpush3.bf16.msra.mxu0 %v776_v33  ;;  %v496_v33 = vld [vmem:[#allocation2 + $0x108] ss:$0 sm:$0xff]  ;;  %v497_v61 = vld [vmem:[#allocation2 + $0x190] ss:$0 sm:$0xff]  ;;  %v498_v13 = vld [vmem:[#allocation2 + $0x218] ss:$0 sm:$0xff] }
  0x2b   :  { %778 = vmatprep.subr.bf16.mxu0 %v921_v0  ;;  %v412_v10 = vld [vmem:[#allocation2 + $0x290] sm:$0xff]  ;;  %v499_v18 = vld [vmem:[#allocation2 + $0x2a0] ss:$0 sm:$0xff] }
  0x2c   :  { %801 = vmatpush3.bf16.msra.mxu1 %v800_v44  ;;  %v319_v44 = vld [vmem:[#allocation2 + $0x208] sm:$0xff] }
  0x2d   :  { %802 = vmatprep.subr.bf16.mxu1 %v921_v0  ;;  %v854_v46 = vpack.c.bf16 %v320_v45, %v319_v44 }
  0x2e   :  { %780 = vmatpush3.bf16.msra.mxu0 %v779_v37 }
  0x2f   :  { %781 = vmatprep.subr.bf16.mxu0 %v921_v0 }
  0x30   :  { %804 = vmatpush3.bf16.msra.mxu1 %v803_v47  ;;  %v398_v47 = vld [vmem:[#allocation2 + $0x220] sm:$0xff] }
  0x31   :  { %805 = vmatprep.subr.bf16.mxu1 %v921_v0 }
  0x32   :  { %783 = vmatpush3.bf16.msra.mxu0 %v782_v40  ;;  %v848_v40 = vpack.c.bf16 %v316_v39, %v315_v38 }
  0x33   :  { %808 = vmatprep.subr.bf16.mxu0 %v921_v0 }
  0x34   :  { %807 = vmatpush3.bf16.msra.mxu1 %v806_v50  ;;  %v401_v50 = vld [vmem:[#allocation2 + $0x238] sm:$0xff] }
  0x35   :  { %618 = vmatmul.mubr.f32.vlgmr.msra.gmra.mrb[0].mxu0 %v25_v41  ;;  %832 = vmatprep.subr.bf16.mxu1 %v921_v0  ;;  %v317_v41 = vld [vmem:[#allocation2 + $0x1f8] sm:$0xff]  ;;  %v860_v51 = vpack.c.bf16 %v401_v50, %v400_v49 }
  0x36   :  { %687 = vmatprep.mubr.msk.f32.mxu0 %vm922_vm0, %v923_v1  ;;  %810 = vmatpush3.bf16.msra.mxu0 %v809_v54  ;;  %v851_v43 = vpack.c.bf16 %v318_v42, %v317_v41  ;;  %v863_v54 = vpack.c.bf16 %v403_v53, %v402_v52 }
  0x37   :  { %811 = vmatprep.subr.bf16.mxu0 %v921_v0 }
  0x3a   :  { %813 = vmatpush3.bf16.msra.mxu0 %v812_v56  ;;  %v405_v56 = vld [vmem:[#allocation2 + $0x258] sm:$0xff] }
  0x3b   :  { %814 = vmatprep.subr.bf16.mxu0 %v921_v0  ;;  %v866_v57 = vpack.c.bf16 %v405_v56, %v404_v55 }
  0x3e   :  { %816 = vmatpush3.bf16.msra.mxu0 %v815_v59  ;;  %v407_v59 = vld [vmem:[#allocation2 + $0x268] sm:$0xff] }
  0x3f   :  { %817 = vmatprep.subr.bf16.mxu0 %v921_v0  ;;  %v869_v60 = vpack.c.bf16 %v407_v59, %v406_v58 }
  0x42   :  { %819 = vmatpush3.bf16.msra.mxu0 %v818_v62 }
  0x43   :  { %820 = vmatprep.subr.bf16.mxu0 %v921_v0 }
  0x46   :  { %822 = vmatpush3.bf16.msra.mxu0 %v821_v3 }
  0x47   :  { %823 = vmatprep.subr.bf16.mxu0 %v921_v0 }
  0x4a   :  { %825 = vmatpush3.bf16.msra.mxu0 %v824_v11  ;;  %v413_v11 = vld [vmem:[#allocation2 + $0x298] sm:$0xff] }
  0x4b   :  { %826 = vmatprep.subr.bf16.mxu0 %v921_v0  ;;  %v878_v12 = vpack.c.bf16 %v413_v11, %v412_v10 }
  0x4e   :  { %828 = vmatpush3.bf16.msra.mxu0 %v827_v14 }
  0x4f   :  { %829 = vmatprep.subr.bf16.mxu0 %v921_v0 }
  0x52   :  { %831 = vmatpush3.bf16.msra.mxu0 %v830_v17 }
  0x53   :  { %856 = vmatprep.subr.bf16.mxu0 %v921_v0 }
 0x108   :  { %v113_v5 = vpop.f32.mrb[0].mxu0 }
 0x109   :  { %v114_v6 = vadd.f32 %v495_v4, %v113_v5  ;;  %v619_v7 = vpop.f32.mrb[1].mxu0  ;;  %v408_v4 = vld [vmem:[#allocation2 + $0x270] sm:$0xff]  ;;  %v409_v5 = vld [vmem:[#allocation2 + $0x278] sm:$0xff] }
 0x10a   :  { %v410_v7 = vld [vmem:[#allocation2 + $0x280] sm:$0xff] }
 0x10b   :  { %886 = vtanh.f32 %v114_v6  ;;  %v872_v6 = vpack.c.bf16 %v409_v5, %v408_v4 }
 0x115   :  { %v887_v8 = vpop.eup %886 }
 0x116   :  { %653 = vmatmul.mubr.f32.vlgmr.msra.gmra.mrb[0].mxu1 %v887_v8  ;;  %v411_v8 = vld [vmem:[#allocation2 + $0x288] sm:$0xff] }
 0x117   :  { %722 = vmatprep.mubr.msk.f32.mxu1 %vm922_vm0, %v923_v1  ;;  %834 = vmatpush3.bf16.msra.mxu1 %v833_v21  ;;  %v875_v9 = vpack.c.bf16 %v411_v8, %v410_v7 }
 0x118   :  { %835 = vmatprep.subr.bf16.mxu1 %v921_v0 }
 0x11b   :  { %837 = vmatpush3.bf16.msra.mxu1 %v836_v23 }
 0x11c   :  { %838 = vmatprep.subr.bf16.mxu1 %v921_v0 }
 0x11f   :  { %840 = vmatpush3.bf16.msra.mxu1 %v839_v26 }
 0x120   :  { %841 = vmatprep.subr.bf16.mxu1 %v921_v0 }
 0x123   :  { %843 = vmatpush3.bf16.msra.mxu1 %v842_v29 }
 0x124   :  { %844 = vmatprep.subr.bf16.mxu1 %v921_v0 }
 0x127   :  { %846 = vmatpush3.bf16.msra.mxu1 %v845_v32 }
 0x128   :  { %847 = vmatprep.subr.bf16.mxu1 %v921_v0 }
 0x12b   :  { %849 = vmatpush3.bf16.msra.mxu1 %v848_v40 }
 0x12c   :  { %850 = vmatprep.subr.bf16.mxu1 %v921_v0 }
 0x12f   :  { %852 = vmatpush3.bf16.msra.mxu1 %v851_v43 }
 0x130   :  { %853 = vmatprep.subr.bf16.mxu1 %v921_v0 }
 0x133   :  { %855 = vmatpush3.bf16.msra.mxu1 %v854_v46 }
 0x1e9   :  { %v206_v34 = vpop.f32.mrb[0].mxu1 }
 0x1ea   :  { %v207_v35 = vadd.f32 %v496_v33, %v206_v34  ;;  %v654_v36 = vpop.f32.mrb[1].mxu1 }
 0x1ec   :  { %888 = vtanh.f32 %v207_v35 }
 0x1f6   :  { %v889_v37 = vpop.eup %888 }
 0x1f7   :  { %688 = vmatmul.mubr.f32.vlgmr.msra.gmra.mrb[2].mxu0 %v889_v37 }
 0x1f8   :  { %757 = vmatprep.mubr.msk.f32.mxu0 %vm922_vm0, %v923_v1  ;;  %v857_v1 = vpack.c.bf16 %v399_v48, %v398_v47 }
 0x1fa   :  { %858 = vmatpush3.bf16.msra.mxu0 %v857_v1 }
 0x1fb   :  { %859 = vmatprep.subr.bf16.mxu0 %v921_v0 }
 0x1fe   :  { %861 = vmatpush3.bf16.msra.mxu0 %v860_v51 }
 0x1ff   :  { %862 = vmatprep.subr.bf16.mxu0 %v921_v0 }
 0x202   :  { %864 = vmatpush3.bf16.msra.mxu0 %v863_v54 }
 0x203   :  { %865 = vmatprep.subr.bf16.mxu0 %v921_v0 }
 0x206   :  { %867 = vmatpush3.bf16.msra.mxu0 %v866_v57 }
 0x207   :  { %868 = vmatprep.subr.bf16.mxu0 %v921_v0 }
 0x20a   :  { %870 = vmatpush3.bf16.msra.mxu0 %v869_v60 }
 0x20b   :  { %871 = vmatprep.subr.bf16.mxu0 %v921_v0 }
 0x20e   :  { %873 = vmatpush3.bf16.msra.mxu0 %v872_v6 }
 0x20f   :  { %874 = vmatprep.subr.bf16.mxu0 %v921_v0 }
 0x212   :  { %876 = vmatpush3.bf16.msra.mxu0 %v875_v9 }
 0x213   :  { %877 = vmatprep.subr.bf16.mxu0 %v921_v0 }
 0x216   :  { %879 = vmatpush3.bf16.msra.mxu0 %v878_v12 }
 0x2ca   :  { %v299_v62 = vpop.f32.mrb[2].mxu0 }
 0x2cb   :  { %v300_v63 = vadd.f32 %v497_v61, %v299_v62  ;;  %v689_v2 = vpop.f32.mrb[3].mxu0 }
 0x2cd   :  { %890 = vtanh.f32 %v300_v63 }
 0x2d7   :  { %v891_v3 = vpop.eup %890 }
 0x2d8   :  { %723 = vmatmul.mubr.f32.vlgmr.msra.gmra.mrb[2].mxu1 %v891_v3 }
 0x3ab   :  { %v392_v14 = vpop.f32.mrb[2].mxu1 }
 0x3ac   :  { %v393_v15 = vadd.f32 %v498_v13, %v392_v14  ;;  %v724_v16 = vpop.f32.mrb[3].mxu1 }
 0x3ae   :  { %892 = vtanh.f32 %v393_v15 }
 0x3b8   :  { %v893_v17 = vpop.eup %892 }
 0x3b9   :  { %758 = vmatmul.mubr.f32.vlgmr.msra.gmra.mrb[4].mxu0 %v893_v17 }
 0x48c   :  { %v485_v19 = vpop.f32.mrb[4].mxu0 }
 0x48d   :  { %v486_v20 = vadd.f32 %v499_v18, %v485_v19  ;;  %v759_v21 = vpop.f32.mrb[5].mxu0 }
 0x48f   :  { %489 = vst [vmem:[%s1009_s2] sm:$0xff] %v486_v20 }
 0x490   :  { %494 = vsyncpa [#allocation3], 1 }

</bundles_post_ra>
